<compile_context>
chip_gen: v5e
topology: v5e:2x2
jax: 0.10.0
libtpu: 0.0.40
codegen_flags: <defaults>
</compile_context>

<pallas_src>
import numpy as np
import jax
import jax.numpy as jnp
from jax.experimental import pallas as pl
from jax.experimental.pallas import tpu as pltpu


def _upsample2x_matrix(n_out_crop: int, n_in: int) -> np.ndarray:
    """1-D interpolation matrix (n_out_crop, n_in) for PyTorch bilinear 2x
    upsample (align_corners=False), cropped to the first n_out_crop outputs."""
    U = np.zeros((n_out_crop, n_in), dtype=np.float32)
    for i in range(n_out_crop):
        src = max((i + 0.5) * 0.5 - 0.5, 0.0)
        i0 = min(int(np.floor(src)), n_in - 1)
        i1 = min(i0 + 1, n_in - 1)
        w1 = src - i0
        U[i, i0] += 1.0 - w1
        U[i, i1] += w1
    return U


def _vmem_limit_bytes() -> int:
    """Generation-aware scoped-VMEM limit: ~48 MiB on v7x (64 MiB physical per
    TC), ~96 MiB on v5e/v6e (128 MiB physical)."""
    cap = 64 * 1024 * 1024
    try:
        info = pltpu.get_tpu_info()
        cap = int(getattr(info, "vmem_capacity_bytes", cap))
    except Exception:
        pass
    return min((cap * 3) // 4, 96 * 1024 * 1024)


def _pick_spatial_tile(hw_pad: int, n_batch: int, c_main: int, lat: int,
                       vmem_limit: int, min_steps: int = 8) -> int:
    """Pick tile T along the (already 128-padded) flattened H*W axis.

    T is a multiple of 128 dividing hw_pad, as large as possible while the
    double-buffered per-step blocks (main + ups + out columns) plus the tiny
    resident wc/bias blocks stay inside the scoped-VMEM budget; if possible
    the grid keeps at least `min_steps` pipeline steps."""
    assert hw_pad % 128 == 0
    resident = 2 * 4 * (lat * c_main + lat)           # wc + bias (x2 buffers)
    headroom = 4 * 1024 * 1024                        # Mosaic internal scratch
    bytes_per_col = 4 * (c_main + 2 * lat)            # main + ups + out columns
    usable = max(vmem_limit - resident - headroom, 2 * 128 * bytes_per_col)
    max_tile = max(128, (usable // (2 * bytes_per_col)) // 128 * 128)
    cands = sorted((t for t in range(128, hw_pad + 1, 128)
                    if hw_pad % t == 0 and t <= max_tile), reverse=True)
    if not cands:
        return 128
    for t in cands:                                   # biggest tile with depth
        if n_batch * (hw_pad // t) >= min_steps:
            return t
    return cands[0]                                   # else: largest that fits


def _fusion_kernel(wc_ref, b_ref, ups_ref, main_ref, out_ref):
    # wc_ref:   (lat, Cm)   1x1-conv weight          (resident)
    # b_ref:    (lat, 1)    conv bias                (resident)
    # ups_ref:  (lat, T)    pre-upsampled `up` columns, this tile
    # main_ref: (Cm, T)     flattened `main` columns, this tile
    # out_ref:  (lat, T)
    conv = jnp.dot(wc_ref[...], main_ref[...],
                   preferred_element_type=jnp.float32)
    out_ref[...] = (conv + ups_ref[...] + b_ref[...]).astype(out_ref.dtype)


def feature_fusion(up, main, wc, bias):
    """up: (N, lat, Hup, Wup), main: (N, Cm, H, W)  (NCHW, float32)
       wc: (lat, Cm) 1x1-conv weight, bias: (lat,)."""
    N, lat, H_up, W_up = up.shape
    Nm, C_main, H, W = main.shape
    assert N == Nm
    # Edge-clamp only matches PyTorch's upsample-then-crop when the upsampled
    # tensor covers `main`.
    assert H <= 2 * H_up and W <= 2 * W_up, (
        "FeatureFusion expects 2x-upsampled `up` to cover `main`")

    HW = H * W

    # Separable bilinear 2x upsample (+ crop to (H, W)) done with two tiny
    # matmuls in the wrapper -- no dense kron interpolation matrix.
    UH = jnp.asarray(_upsample2x_matrix(H, H_up))      # (H, Hup)
    UW = jnp.asarray(_upsample2x_matrix(W, W_up))      # (W, Wup)
    upw = jnp.einsum('nlkm,jm->nlkj', up, UW)          # (N, lat, Hup, W)
    ups = jnp.einsum('nlkj,ik->nlij', upw, UH)         # (N, lat, H,   W)

    ups2 = ups.reshape(N, lat, HW)                     # contiguous reshapes
    main2 = main.reshape(N, C_main, HW)
    b2 = bias.reshape(lat, 1)

    # Lane-dense: pad the flattened spatial axis to a multiple of 128 so every
    # output block gets unmasked stores; slice the padding off afterwards.
    HW_pad = ((HW + 127) // 128) * 128
    if HW_pad != HW:
        pad = HW_pad - HW
        main2 = jnp.pad(main2, ((0, 0), (0, 0), (0, pad)))
        ups2 = jnp.pad(ups2, ((0, 0), (0, 0), (0, pad)))

    vmem_limit = _vmem_limit_bytes()
    T = _pick_spatial_tile(HW_pad, N, C_main, lat, vmem_limit)
    S = HW_pad // T

    cost = pl.CostEstimate(
        flops=2 * N * lat * C_main * HW_pad + 2 * N * lat * HW_pad,
        transcendentals=0,
        bytes_accessed=4 * (N * C_main * HW_pad + 2 * N * lat * HW_pad
                            + lat * C_main + lat),
    )

    grid_spec = pltpu.PrefetchScalarGridSpec(
        num_scalar_prefetch=0,
        grid=(N, S),
        in_specs=[
            pl.BlockSpec((lat, C_main), lambda n, s: (0, 0)),
            pl.BlockSpec((lat, 1), lambda n, s: (0, 0)),
            pl.BlockSpec((None, lat, T), lambda n, s: (n, 0, s)),
            pl.BlockSpec((None, C_main, T), lambda n, s: (n, 0, s)),
        ],
        out_specs=pl.BlockSpec((None, lat, T), lambda n, s: (n, 0, s)),
    )

    out2 = pl.pallas_call(
        _fusion_kernel,
        out_shape=jax.ShapeDtypeStruct((N, lat, HW_pad), jnp.float32),
        grid_spec=grid_spec,
        compiler_params=pltpu.CompilerParams(
            dimension_semantics=("parallel", "parallel"),
            vmem_limit_bytes=vmem_limit),
        cost_estimate=cost,
    )(wc, b2, ups2, main2)

    if HW_pad != HW:
        out2 = out2[:, :, :HW]
    return out2.reshape(N, lat, H, W)


def _reference_numpy(up, main, wc, bias):
    """Independent NumPy reference of the PyTorch forward."""
    up = np.asarray(up); main = np.asarray(main)
    wc = np.asarray(wc); bias = np.asarray(bias)
    N, lat, Hu, Wu = up.shape
    _, _, H, W = main.shape
    conv = np.einsum('ok,nkhw->nohw', wc, main) + bias[None, :, None, None]
    res = np.zeros((N, lat, H, W), np.float32)
    for i in range(H):
        sy = max((i + 0.5) * 0.5 - 0.5, 0.0)
        y0 = min(int(np.floor(sy)), Hu - 1); y1 = min(y0 + 1, Hu - 1)
        wy1 = sy - y0; wy0 = 1.0 - wy1
        for j in range(W):
            sx = max((j + 0.5) * 0.5 - 0.5, 0.0)
            x0 = min(int(np.floor(sx)), Wu - 1); x1 = min(x0 + 1, Wu - 1)
            wx1 = sx - x0; wx0 = 1.0 - wx1
            res[:, :, i, j] = (wy0 * wx0 * up[:, :, y0, x0]
                               + wy0 * wx1 * up[:, :, y0, x1]
                               + wy1 * wx0 * up[:, :, y1, x0]
                               + wy1 * wx1 * up[:, :, y1, x1])
    return res + conv


if __name__ == "__main__":
    key = jax.random.PRNGKey(0)
    k_up, k_main, k_w, k_b = jax.random.split(key, 4)

    N, C_main, lat_ch = 2, 8, 16
    H_up, W_up = 8, 8          # `up` spatial size
    H, W = 16, 16              # `main` spatial size (2x upsample matches)

    up = jax.random.normal(k_up, (N, lat_ch, H_up, W_up), dtype=jnp.float32)
    main = jax.random.normal(k_main, (N, C_main, H, W), dtype=jnp.float32)
    # main_conv = nn.Conv2d(C_main, lat_ch, 1) -> weight (lat, Cm), bias (lat,)
    wc = jax.random.normal(k_w, (lat_ch, C_main), dtype=jnp.float32) * 0.1
    bias = jax.random.normal(k_b, (lat_ch,), dtype=jnp.float32) * 0.1

    out = feature_fusion(up, main, wc, bias)
    out = jax.block_until_ready(out)

    ref = _reference_numpy(up, main, wc, bias)
    np.testing.assert_allclose(np.asarray(out), ref, rtol=1e-5, atol=2e-5)

    print("KERNEL_OK")
</pallas_src>

<mosaic_0001>
module attributes {stable_mosaic.version = 11 : i64} {
  func.func @_fusion_kernel(%arg0: i32, %arg1: i32, %arg2: memref<16x8xf32, #tpu.memory_space<vmem>>, %arg3: memref<16x1xf32, #tpu.memory_space<vmem>>, %arg4: memref<1x16x256xf32, #tpu.memory_space<vmem>>, %arg5: memref<1x8x256xf32, #tpu.memory_space<vmem>>, %arg6: memref<1x16x256xf32, #tpu.memory_space<vmem>>) attributes {dimension_semantics = [#tpu.dimension_semantics<parallel>, #tpu.dimension_semantics<parallel>], iteration_bounds = array<i64: 2, 1>, scalar_prefetch = 0 : i64, scratch_operands = 0 : i64, tpu.core_type = #tpu.core_type<tc>, window_params = [{pipeline_mode = #tpu.pipeline_mode<synchronous>, transform_indices = @transform_0, window_bounds = array<i64: 16, 8>}, {pipeline_mode = #tpu.pipeline_mode<synchronous>, transform_indices = @transform_1, window_bounds = array<i64: 16, 1>}, {transform_indices = @transform_2, window_bounds = array<i64: 1, 16, 256>}, {transform_indices = @transform_3, window_bounds = array<i64: 1, 8, 256>}, {transform_indices = @transform_4, window_bounds = array<i64: 1, 16, 256>}]} {
    %c0 = arith.constant 0 : index
    %c0_0 = arith.constant 0 : index
    %0 = vector.load %arg2[%c0, %c0_0] : memref<16x8xf32, #tpu.memory_space<vmem>>, vector<16x8xf32>
    %c0_1 = arith.constant 0 : index
    %c0_2 = arith.constant 0 : index
    %c0_3 = arith.constant 0 : index
    %1 = vector.load %arg5[%c0_1, %c0_2, %c0_3] : memref<1x8x256xf32, #tpu.memory_space<vmem>>, vector<1x8x256xf32>
    %2 = vector.shape_cast %1 : vector<1x8x256xf32> to vector<8x256xf32>
    %cst = arith.constant dense<0.000000e+00> : vector<16x256xf32>
    %3 = tpu.matmul %0, %2, %cst {dimension_numbers = #tpu.dot_dimension_numbers<[1], [0], [0], [1], [0, 0, 1, 1], [], []>} : vector<16x8xf32>, vector<8x256xf32>, vector<16x256xf32> -> vector<16x256xf32>
    %c0_4 = arith.constant 0 : index
    %c0_5 = arith.constant 0 : index
    %c0_6 = arith.constant 0 : index
    %4 = vector.load %arg4[%c0_4, %c0_5, %c0_6] : memref<1x16x256xf32, #tpu.memory_space<vmem>>, vector<1x16x256xf32>
    %5 = vector.shape_cast %4 : vector<1x16x256xf32> to vector<16x256xf32>
    %6 = arith.addf %3, %5 : vector<16x256xf32>
    %c0_7 = arith.constant 0 : index
    %c0_8 = arith.constant 0 : index
    %7 = vector.load %arg3[%c0_7, %c0_8] : memref<16x1xf32, #tpu.memory_space<vmem>>, vector<16x1xf32>
    %8 = vector.broadcast %7 : vector<16x1xf32> to vector<16x256xf32>
    %9 = arith.addf %6, %8 : vector<16x256xf32>
    %c0_9 = arith.constant 0 : index
    %c0_10 = arith.constant 0 : index
    %c0_11 = arith.constant 0 : index
    %10 = vector.load %arg6[%c0_9, %c0_10, %c0_11] : memref<1x16x256xf32, #tpu.memory_space<vmem>>, vector<1x16x256xf32>
    %11 = vector.shape_cast %10 : vector<1x16x256xf32> to vector<16x256xf32>
    %12 = vector.shape_cast %9 : vector<16x256xf32> to vector<1x16x256xf32>
    tpu.vector_store %arg6[%c0_9, %c0_10, %c0_11], %12 {strides = array<i32>} : memref<1x16x256xf32, #tpu.memory_space<vmem>>, vector<1x16x256xf32>,
    return
  }
  func.func @transform_0(%arg0: i32, %arg1: i32) -> (i32, i32) {
    %c0_i32 = arith.constant 0 : i32
    %c0_i32_0 = arith.constant 0 : i32
    %c0_i32_1 = arith.constant 0 : i32
    return %c0_i32, %c0_i32_0 : i32, i32
  }
  func.func @transform_1(%arg0: i32, %arg1: i32) -> (i32, i32) {
    %c0_i32 = arith.constant 0 : i32
    %c0_i32_0 = arith.constant 0 : i32
    %c0_i32_1 = arith.constant 0 : i32
    return %c0_i32, %c0_i32_0 : i32, i32
  }
  func.func @transform_2(%arg0: i32, %arg1: i32) -> (i32, i32, i32) {
    %c0_i32 = arith.constant 0 : i32
    %c0_i32_0 = arith.constant 0 : i32
    return %arg0, %c0_i32, %arg1 : i32, i32, i32
  }
  func.func @transform_3(%arg0: i32, %arg1: i32) -> (i32, i32, i32) {
    %c0_i32 = arith.constant 0 : i32
    %c0_i32_0 = arith.constant 0 : i32
    return %arg0, %c0_i32, %arg1 : i32, i32, i32
  }
  func.func @transform_4(%arg0: i32, %arg1: i32) -> (i32, i32, i32) {
    %c0_i32 = arith.constant 0 : i32
    %c0_i32_0 = arith.constant 0 : i32
    return %arg0, %c0_i32, %arg1 : i32, i32, i32
  }
}

</mosaic_0001>

<bundles_post_ra>
// kernel: tpu_custom_call.1
= control target key start
LH: loop header
LB: loop body
LE: loop exit
PB: predicated region body
PF: predicated region fallthrough
CT: control target
= control target key end

     0   :  { %9 = vsyncpa [#allocation3], 0  ;;  %s863_s0 = inlined_call_operand.vmem [shape: f32[16,8], index: 0, kind: input, shape index: {}]   ;;  %s864_s1 = inlined_call_operand.vmem [shape: f32[16,1], index: 1, kind: input, shape index: {}]   ;;  %s865_s2 = inlined_call_operand.hbm [shape: f32[2,16,256], index: 2, kind: input, shape index: {}]   ;;  %s866_s3 = inlined_call_operand.vmem [shape: f32[2,8,256], index: 3, kind: input, shape index: {}]   ;;  %s867_s4 = inlined_call_operand.hbm [shape: f32[2,16,256], index: 4, kind: output, shape index: {}]  }
   0x1   :  { %11 = vsyncpa [#allocation3 + $0x1], 0 }
   0x2   :  { %12 = vsyncpa [#allocation4], 0 }
   0x3   :  { %14 = vsyncpa [#allocation4 + $0x1], 0  ;;  %s716_s15 = smov 0   ;;  %s718_s16 = smov 0  }
   0x4   :  { %s720_s17 = smov 0   ;;  %s722_s18 = smov 0  }
   0x5   :  { %s724_s19 = smov 0   ;;  %s726_s20 = smov 0  }
   0x6 LB: > { %s478_s21 = sadd.s32 4294967295, %s684_s20   ;;  %s479_s22 = sadd.s32 4294967294, %s684_s20   ;;  %s684_s20 = sphi %s726_s20, %s20_s20   ;;  %s680_s19 = sphi %s724_s19, %s876_s19   ;;  %s676_s18 = sphi %s722_s18, %s875_s18   ;;  %s672_s17 = sphi %s720_s17, %s874_s17   ;;  %s668_s16 = sphi %s718_s16, %s873_s16   ;;  %s664_s15 = sphi %s716_s15, %s872_s15  }
   0x7   : > { %s32_s23 = sadd.s32 1, %s680_s19  ;;  %s83_s24 = sadd.s32 1, %s672_s17 }
   0x8   : > { %p34_p0 = scmp.ge.s32.totalorder %s32_s23, 2  ;;  %p90_p1 = scmp.ne.s32.totalorder %s672_s17, %s668_s16 }
   0x9   : > { %p91_p2 = scmp.eq.s32.totalorder %s684_s20, 0  ;;  %p96_p3 = scmp.ne.s32.totalorder %s668_s16, %s664_s15 }
   0xa   : > { %s878_s23 = smov (%p34_p0, %s32_s23), 0  ;;  %p97_p5 = scmp.eq.s32.totalorder %s478_s21, 0 }
   0xb   : > { %p757_p4 = por %p91_p2, %p90_p1  ;;  %s78_s26 = ssub.s32 %s680_s19, %s878_s23 }
   0xc   : > { %p150_p6 = scmp.eq.s32.totalorder %s478_s21, 1  ;;  %p81_p7 = scmp.eq.s32.totalorder %s78_s26, 0 }
   0xd   : > { %p763_p8 = por %p97_p5, %p96_p3  ;;  %p156_p10 = scmp.eq.s32.totalorder %s479_s22, 1 }
   0xe   : > { %p767_p9 = por %p150_p6, %p90_p1  ;;  %p481_p12 = scmp.ge.s32.totalorder %s684_s20, 2 }
   0xf   : > { %s772_s29 = scalar_select %p81_p7, %s672_s17, %s83_s24  }
  0x10   : > { %p774_p11 = por %p156_p10, %p96_p3  ;;  %p516_p13 = scmp.lt.s32.totalorder %s684_s20, 2 }
  0x11   : > { %s182_s5 = sand.u32 1, %s672_s17   ;;  %s499_s7 = sshll.u32 %s680_s19, 5 }
  0x12   : > { %s482_s6 = sshll.u32 %s182_s5, 5  ;;  %s193_s10 = scalar_lea.hbm %s865_s2, %s499_s7 }
  0x13   : > { %s186_s11 = scalar_lea.vmem [#allocation2], %s482_s6  ;;  %s194_s13 = sshll.u32 %s193_s10, 4  ;;  %s195_s13 = int_to_ptr.hbm [resolvable:$true] %s194_s13 }
  0x14   : > { %s196_s12 = sshll.u32 %s186_s11, 4  ;;  %p509_p0 = pnand %p516_p13, %p757_p4  ;;  %s197_s12 = int_to_ptr.vmem [resolvable:$true] %s196_s12 }
  0x15   : > { %p485_p1 = scmp.ge.s32.totalorder %s684_s20, 1  ;;  %s183_s14 = scalar_lea.sflag [#allocation3], %s182_s5 }
  0x16   : > { %s686_s21 = smov 256   ;;  %s687_s22 = smov 16  }
  0x17   : > { %511 = dma.hbm_to_vmem [thread:$0]  (!%p509_p0), %s195_s13, 512, %s197_s12, %s183_s14, %s686_s21, %s686_s21, %s687_s22  }
  0x18   : > { %p217_p2 = scmp.lt.s32.totalorder %s684_s20, 3 }
  0x1a   : > { %p218_p3 = pnand %p485_p1, %p217_p2 }
  0x1b   : > { %s790_s24 = sand.u32 (!%p218_p3), 1, %s668_s16  }
  0x1c   : > { %221 = sbr.rel (%p218_p3) target bundleno = 184 (0xb8), region = 36  ;;  %s486_s26 = sshll.u32 (!%p218_p3), %s790_s24, 5 }
  0x1d   : > { %s224_s6 = scalar_lea.sflag (!%p218_p3), [#allocation3], %s790_s24  ;;  %s796_s25 = scalar_lea.vmem (!%p218_p3), [#allocation2], %s486_s26 }
  0x21   : > { %655 = dma.done.wait (%p763_p8), %s224_s6, 512  }
  0x22   : > { %657 = vsyncadd (%p763_p8), %s224_s6, 4294966784  ;;  %p264_p4 = scmp.lt.s32.totalorder %s676_s18, 1  ;;  %v688_v0 = vmov 0   ;;  %v274_v3 = vld [vmem:[%s863_s0] sm:$0xff]  ;;  %vm282_vm0 = vcmask 64512   ;;  %v275_v4 = vld [vmem:[%s863_s0 + $0x8] sm:$0xff] }
  0x23   : > { %571 = vset.pattern.permute.xlu0 %v688_v0  ;;  %v335_v5 = vld [vmem:[%s864_s1] sm:$0xff]  ;;  %v336_v6 = vld [vmem:[%s864_s1 + $0x8] sm:$0xff]  ;;  %v280_v16 = vld [vmem:[%s796_s25 + $0x10] sm:$0xff]  ;;  %s622_s14 = scalar_lea.hbm %s867_s4, 64 }
  0x24   : > { %s265_s5 = scalar_select %p264_p4, %s676_s18, 1  ;;  %339 = vperm.xlu0 %571, %v335_v5   ;;  %v278_v8 = vld [vmem:[%s796_s25] sm:$0xff]  ;;  %v279_v9 = vld [vmem:[%s796_s25 + $0x8] sm:$0xff]  ;;  %v281_v17 = vld [vmem:[%s796_s25 + $0x18] sm:$0xff] }
  0x26   : > { %s500_s7 = sshll.u32 %s265_s5, 4  ;;  %s501_s5 = sshll.u32 %s676_s18, 5 }
  0x27   : > { %s271_s10 = scalar_lea.vmem %s866_s3, %s500_s7  ;;  %s369_s9 = scalar_lea.hbm %s867_s4, %s501_s5 }
  0x28   : > { %v276_v1 = vld [vmem:[%s271_s10] sm:$0xff]  ;;  %v277_v2 = vld [vmem:[%s271_s10 + $0x8] sm:$0xff]  ;;  %s261_s10 = scalar_lea.vmem [#allocation5], %s486_s26  ;;  %s372_s12 = sshll.u32 %s369_s9, 4  ;;  %s373_s12 = int_to_ptr.hbm [resolvable:$true] %s372_s12 }
  0x29   : > { %304 = vmatpush.msra.mxu0 %v276_v1  ;;  %502 = vmatpush.msra.mxu2 %v276_v1  ;;  %s370_s11 = sshll.u32 %s261_s10, 4  ;;  %s356_s18 = scalar_lea.sflag [#allocation4], %s790_s24  ;;  %s371_s11 = int_to_ptr.vmem [resolvable:$true] %s370_s11 }
  0x2a   : > { %327 = vmatpush.msra.mxu1 %v277_v2  ;;  %503 = vmatpush.msra.mxu3 %v277_v2  ;;  %s616_s26 = sshra.s32 %s373_s12, 4  ;;  %s617_s26 = int_to_ptr.hbm [resolvable:$true] %s616_s26 }
  0x2b   : > { %490 = vmatmul.msk.f32.vlgmr.msra.gmra.mxu0 %vm282_vm0, %v274_v3  ;;  %491 = vmatmul.msk.f32.vlgmr.msra.gmra.mxu2 %vm282_vm0, %v275_v4  ;;  %s618_s27 = scalar_lea.hbm %s617_s26, 32  ;;  %p623_p8 = scmp.lt.s32.totalorder %s617_s26, %s867_s4 }
  0x2c   : > { %492 = vmatmul.msk.f32.vlgmr.msra.gmra.mxu1 %vm282_vm0, %v274_v3  ;;  %493 = vmatmul.msk.f32.vlgmr.msra.gmra.mxu3 %vm282_vm0, %v275_v4  ;;  %p619_p5 = scmp.ne.s32.totalorder %s617_s26, %s618_s27  ;;  %p624_p10 = scmp.lt.s32.totalorder %s622_s14, %s618_s27 }
  0x2d   : > { %344 = vperm.xlu0 %571, %v336_v6  }
  0x2e   : > { %p620_p6 = pnand %p619_p5, %p767_p9  ;;  %p625_p13 = por %p624_p10, %p623_p8 }
  0x30   : > { %p621_p7 = pneg %p620_p6 }
  0x32   : > { %p626_p0 = pnand %p625_p13, %p621_p7 }
  0x96   : > { %v340_v7 = vpop.permute.xlu0 %339 }
  0x9f   : > { %v345_v21 = vpop.permute.xlu0 %344 }
  0xa8   : > { %v306_v10 = vpop.f32.mrf.mxu0 }
  0xa9   : > { %v307_v11 = vadd.f32 %v306_v10, %v278_v8  ;;  %v329_v12 = vpop.f32.mrf.mxu1 }
  0xaa   : > { %v330_v13 = vadd.f32 %v329_v12, %v279_v9 }
  0xab   : > { %v347_v14 = vadd.f32 %v340_v7, %v307_v11 }
  0xac   : > { %v348_v15 = vadd.f32 %v340_v7, %v330_v13 }
  0xad   : > { %351 = vst [vmem:[%s261_s10] sm:$0xff] %v347_v14 }
  0xae   : > { %352 = vst [vmem:[%s261_s10 + $0x8] sm:$0xff] %v348_v15  ;;  %v309_v18 = vpop.f32.mrf.mxu2 }
  0xaf   : > { %v310_v19 = vadd.f32 %v309_v18, %v280_v16  ;;  %v332_v20 = vpop.f32.mrf.mxu3 }
  0xb0   : > { %v333_v22 = vadd.f32 %v332_v20, %v281_v17 }
  0xb1   : > { %v349_v23 = vadd.f32 %v345_v21, %v310_v19 }
  0xb2   : > { %v350_v24 = vadd.f32 %v345_v21, %v333_v22 }
  0xb3   : > { %353 = vst [vmem:[%s261_s10 + $0x10] sm:$0xff] %v349_v23 }
  0xb4   : > { %354 = vst [vmem:[%s261_s10 + $0x18] sm:$0xff] %v350_v24 }
  0xb5   : > { %629 = shalt.err (!%p626_p0)
}
  0xb6   : > { %s689_s24 = smov 256   ;;  %s690_s6 = smov 16  }
  0xb7   : > { %506 = dma.vmem_to_hbm [thread:$0]  (%p767_p9), %s371_s11, 512, %s373_s12, %s356_s18, %s689_s24, %s689_s24, %s690_s6  }
  0xb8 PF: > { %s387_s5 = sand.u32 1, %s664_s15   ;;  %p513_p1 = pnand %p481_p12, %p774_p11 }
  0xb9   : > { %s388_s7 = scalar_lea.sflag [#allocation4], %s387_s5 }
  0xba   : > { %p514_p2 = pneg %p513_p1 }
  0xbc   : > { %659 = dma.done.wait (%p514_p2), %s388_s7, 512  }
  0xbd   : > { %661 = vsyncadd (%p514_p2), %s388_s7, 4294966784  ;;  %s20_s20 = sadd.s32 1, %s684_s20   ;;  %s872_s15 = smov %s668_s16 }
  0xbe   : > { %p17_p3 = scmp.ge.s32.totalorder %s20_s20, 4   ;;  %s873_s16 = smov %s672_s17 }
  0xbf   : > { %s874_s17 = smov %s772_s29  ;;  %s875_s18 = smov %s680_s19 }
  0xc0   : > { %s876_s19 = smov %s878_s23  ;;  %19 = sbr.rel (!%p17_p3) target bundleno = 6 (0x6), region = 84 }
  0xc5   :  { %394 = vsyncpa [#allocation3], 1 }
  0xc6   :  { %396 = vsyncpa [#allocation3 + $0x1], 1 }
  0xc7   :  { %397 = vsyncpa [#allocation4], 1 }
  0xc8   :  { %399 = vsyncpa [#allocation4 + $0x1], 1 }

</bundles_post_ra>
